<compile_context>
chip_gen: v6e
topology: v6e:2x2x1
jax: 0.10.0
libtpu: 0.0.40
codegen_flags: <defaults>
</compile_context>

<pallas_src>
import functools

import jax
import jax.numpy as jnp
from jax.experimental import pallas as pl
from jax.experimental.pallas import tpu as pltpu


def _uop_attention_kernel(has_mask, *refs):
    if has_mask:
        (x1_ref, x2_ref, mask_ref,
         wa_ref, ba_ref, wt_ref, bt_ref, wp_ref, bp_ref, out_ref) = refs
    else:
        (x1_ref, x2_ref,
         wa_ref, ba_ref, wt_ref, bt_ref, wp_ref, bp_ref, out_ref) = refs
        mask_ref = None

    tb, s, d2 = x2_ref.shape
    pp = wa_ref.shape[1]

    x1 = x1_ref[...]                                   # (TB, D1)    native dtype
    x2 = x2_ref[...]                                   # (TB, S, D2) native dtype

    # attr linear -> (TB, Pp), f32 MXU accumulation.
    h1 = jnp.dot(x1, wa_ref[...],
                 preferred_element_type=jnp.float32) + ba_ref[...]

    # text linear -> (TB, S, Pp).  Collapse (TB, S) into rows for a plain 2-D
    # MXU matmul; with S a multiple of 8 (sublane-aligned) this reshape is a
    # free re-view (no VMEM copy).
    h2 = jnp.dot(x2.reshape(tb * s, d2), wt_ref[...],
                 preferred_element_type=jnp.float32)
    h2 = h2.reshape(tb, s, pp) + bt_ref[...]

    # tanh + pooling linear (Pp is lane-dense; padded wp columns are zero).
    t = jnp.tanh(h1[:, None, :] + h2)                  # (TB, S, Pp) f32
    scores = jnp.sum(t * wp_ref[...], axis=-1) + bp_ref[0, 0]   # (TB, S) f32

    if mask_ref is not None:
        scores = jnp.where(mask_ref[...] == 0, jnp.float32(-1e9), scores)

    # Softmax over S (kept in f32 on all chips).
    m = jnp.max(scores, axis=-1, keepdims=True)
    e = jnp.exp(scores - m)
    denom = jnp.sum(e, axis=-1, keepdims=True)
    inv = pl.reciprocal(denom, approx=True)            # EUP slot (free-ish)
    inv = inv * (2.0 - denom * inv)                    # one Newton step -> ~f32 exact
    w = e * inv                                        # (TB, S)

    # Weighted sum over S on the MXU: (TB,1,S) @ (TB,S,D2) -> (TB,1,D2).
    out = jnp.einsum("bqs,bsd->bqd",
                     w[:, None, :].astype(x2.dtype), x2,
                     preferred_element_type=jnp.float32)[:, 0, :]
    out_ref[...] = out.astype(out_ref.dtype)


def _pad_last(arr, target):
    p = arr.shape[-1]
    if p == target:
        return arr
    pad = [(0, 0)] * (arr.ndim - 1) + [(0, target - p)]
    return jnp.pad(arr, pad)


def uop_attention(x1, x2, params, mask=None, *, batch_tile=64, lane_pad=128):
    """Pallas implementation of UoPAttention.forward.

    params (nn.Linear weights stored transposed, [in, out]):
      wa (D1,P), ba (1,P)  : pre_pooling_linear_attr
      wt (D2,P), bt (1,P)  : pre_pooling_linear_text
      wp (1,P),  bp (1,1)  : pooling_linear
    """
    B, D1 = x1.shape
    _, S, D2 = x2.shape
    P = params["wa"].shape[1]

    # Lane-dense pre-pooling width (zero padding is exact through
    # linear + tanh + pooling).  128 works on all chips; use 256 on v6e/v7x
    # if weights allow for full native MXU N.
    Pp = max(lane_pad, pl.cdiv(P, lane_pad) * lane_pad)
    wa = _pad_last(params["wa"], Pp)
    ba = _pad_last(params["ba"], Pp)
    wt = _pad_last(params["wt"], Pp)
    bt = _pad_last(params["bt"], Pp)
    wp = _pad_last(params["wp"], Pp)
    bp = params["bp"].reshape(1, 1)

    # Batch tile: rows are independent; 64 rows keeps double-buffered x2 tiles
    # plus the f32 (TB,S,Pp) intermediate comfortably under the v7x scoped
    # VMEM budget for typical S/D2.  (Shrink if S*D2 is very large.)
    TB = B if B <= batch_tile else batch_tile
    grid = (pl.cdiv(B, TB),)

    has_mask = mask is not None
    inputs = [x1, x2]
    in_specs = [
        pl.BlockSpec((TB, D1), lambda i: (i, 0)),          # x1
        pl.BlockSpec((TB, S, D2), lambda i: (i, 0, 0)),    # x2
    ]
    if has_mask:
        inputs.append(mask)
        in_specs.append(pl.BlockSpec((TB, S), lambda i: (i, 0)))
    inputs += [wa, ba, wt, bt, wp, bp]
    in_specs += [
        pl.BlockSpec((D1, Pp), lambda i: (0, 0)),          # wa
        pl.BlockSpec((1, Pp), lambda i: (0, 0)),           # ba
        pl.BlockSpec((D2, Pp), lambda i: (0, 0)),          # wt
        pl.BlockSpec((1, Pp), lambda i: (0, 0)),           # bt
        pl.BlockSpec((1, Pp), lambda i: (0, 0)),           # wp
        pl.BlockSpec(memory_space=pltpu.MemorySpace.SMEM),  # bp (scalar)
    ]
    out_specs = pl.BlockSpec((TB, D2), lambda i: (i, 0))

    kernel = functools.partial(_uop_attention_kernel, has_mask)
    return pl.pallas_call(
        kernel,
        grid=grid,
        in_specs=in_specs,
        out_specs=out_specs,
        out_shape=jax.ShapeDtypeStruct((B, D2), x2.dtype),
        compiler_params=pltpu.CompilerParams(
            dimension_semantics=("parallel",),   # megacore on v7x
            vmem_limit_bytes=32 * 1024 * 1024,
        ),
    )(*inputs)


def _reference(x1, x2, params, mask=None):
    h1 = x1 @ params["wa"] + params["ba"]
    h2 = x2 @ params["wt"] + params["bt"]
    t = jnp.tanh(h1[:, None, :] + h2)
    s = jnp.sum(t * params["wp"], axis=-1) + params["bp"][0, 0]
    if mask is not None:
        s = jnp.where(mask == 0, -1e9, s)
    w = jax.nn.softmax(s, axis=-1)
    return jnp.sum(x2 * w[:, :, None], axis=1)


if __name__ == "__main__":
    # Small shapes consistent with the module:
    #   input_1: (B, input1_dim), input_2: (B, S, input2_dim)
    B, S, D1, D2, P = 2, 8, 32, 32, 16

    key = jax.random.PRNGKey(0)
    keys = jax.random.split(key, 9)
    x1 = jax.random.normal(keys[0], (B, D1), jnp.float32)
    x2 = jax.random.normal(keys[1], (B, S, D2), jnp.float32)

    # Deterministic synthetic parameters (shapes from __init__).
    params = {
        "wa": jax.random.normal(keys[2], (D1, P), jnp.float32) * 0.1,  # attr weight^T
        "ba": jax.random.normal(keys[3], (1, P), jnp.float32) * 0.1,   # attr bias
        "wt": jax.random.normal(keys[4], (D2, P), jnp.float32) * 0.1,  # text weight^T
        "bt": jax.random.normal(keys[5], (1, P), jnp.float32) * 0.1,   # text bias
        "wp": jax.random.normal(keys[6], (1, P), jnp.float32) * 0.1,   # pooling weight
        "bp": jax.random.normal(keys[7], (1, 1), jnp.float32) * 0.1,   # pooling bias
    }

    mask = (jax.random.uniform(keys[8], (B, S)) > 0.3).astype(jnp.int32)
    mask = mask.at[:, 0].set(1)  # at least one valid position per row

    out_nomask = uop_attention(x1, x2, params, mask=None)
    out_masked = uop_attention(x1, x2, params, mask=mask)
    jax.block_until_ready((out_nomask, out_masked))

    ref_nomask = _reference(x1, x2, params, mask=None)
    ref_masked = _reference(x1, x2, params, mask=mask)

    assert out_nomask.shape == (B, D2)
    # 1e-4 tolerance: MXU f32 accumulation order + Newton-refined EUP
    # reciprocal differ from the XLA reference at the ~1e-6 level.
    assert jnp.allclose(out_nomask, ref_nomask, atol=1e-4, rtol=1e-4)
    assert jnp.allclose(out_masked, ref_masked, atol=1e-4, rtol=1e-4)

    print("KERNEL_OK")
</pallas_src>

<mosaic_0001>
module attributes {stable_mosaic.version = 11 : i64} {
  func.func @_uop_attention_kernel(%arg0: i32, %arg1: memref<2x32xf32, #tpu.memory_space<vmem>>, %arg2: memref<2x8x32xf32, #tpu.memory_space<vmem>>, %arg3: memref<32x128xf32, #tpu.memory_space<vmem>>, %arg4: memref<1x128xf32, #tpu.memory_space<vmem>>, %arg5: memref<32x128xf32, #tpu.memory_space<vmem>>, %arg6: memref<1x128xf32, #tpu.memory_space<vmem>>, %arg7: memref<1x128xf32, #tpu.memory_space<vmem>>, %arg8: memref<1x1xf32, #tpu.memory_space<smem>>, %arg9: memref<2x32xf32, #tpu.memory_space<vmem>>) attributes {dimension_semantics = [#tpu.dimension_semantics<parallel>], iteration_bounds = array<i64: 1>, scalar_prefetch = 0 : i64, scratch_operands = 0 : i64, tpu.core_type = #tpu.core_type<tc>, window_params = [{transform_indices = @transform_0, window_bounds = array<i64: 2, 32>}, {transform_indices = @transform_1, window_bounds = array<i64: 2, 8, 32>}, {pipeline_mode = #tpu.pipeline_mode<synchronous>, transform_indices = @transform_2, window_bounds = array<i64: 32, 128>}, {pipeline_mode = #tpu.pipeline_mode<synchronous>, transform_indices = @transform_3, window_bounds = array<i64: 1, 128>}, {pipeline_mode = #tpu.pipeline_mode<synchronous>, transform_indices = @transform_4, window_bounds = array<i64: 32, 128>}, {pipeline_mode = #tpu.pipeline_mode<synchronous>, transform_indices = @transform_5, window_bounds = array<i64: 1, 128>}, {pipeline_mode = #tpu.pipeline_mode<synchronous>, transform_indices = @transform_6, window_bounds = array<i64: 1, 128>}, {transform_indices = @transform_7, window_bounds = array<i64: 1, 1>}, {transform_indices = @transform_8, window_bounds = array<i64: 2, 32>}]} {
    %c0 = arith.constant 0 : index
    %c0_0 = arith.constant 0 : index
    %0 = vector.load %arg1[%c0, %c0_0] : memref<2x32xf32, #tpu.memory_space<vmem>>, vector<2x32xf32>
    %c0_1 = arith.constant 0 : index
    %c0_2 = arith.constant 0 : index
    %c0_3 = arith.constant 0 : index
    %1 = vector.load %arg2[%c0_1, %c0_2, %c0_3] : memref<2x8x32xf32, #tpu.memory_space<vmem>>, vector<2x8x32xf32>
    %c0_4 = arith.constant 0 : index
    %c0_5 = arith.constant 0 : index
    %2 = vector.load %arg3[%c0_4, %c0_5] : memref<32x128xf32, #tpu.memory_space<vmem>>, vector<32x128xf32>
    %cst = arith.constant dense<0.000000e+00> : vector<2x128xf32>
    %3 = tpu.matmul %0, %2, %cst {dimension_numbers = #tpu.dot_dimension_numbers<[1], [0], [0], [1], [0, 0, 1, 1], [], []>} : vector<2x32xf32>, vector<32x128xf32>, vector<2x128xf32> -> vector<2x128xf32>
    %c0_6 = arith.constant 0 : index
    %c0_7 = arith.constant 0 : index
    %4 = vector.load %arg4[%c0_6, %c0_7] : memref<1x128xf32, #tpu.memory_space<vmem>>, vector<1x128xf32>
    %5 = vector.broadcast %4 : vector<1x128xf32> to vector<2x128xf32>
    %6 = arith.addf %3, %5 : vector<2x128xf32>
    %7 = vector.shape_cast %1 : vector<2x8x32xf32> to vector<16x32xf32>
    %c0_8 = arith.constant 0 : index
    %c0_9 = arith.constant 0 : index
    %8 = vector.load %arg5[%c0_8, %c0_9] : memref<32x128xf32, #tpu.memory_space<vmem>>, vector<32x128xf32>
    %cst_10 = arith.constant dense<0.000000e+00> : vector<16x128xf32>
    %9 = tpu.matmul %7, %8, %cst_10 {dimension_numbers = #tpu.dot_dimension_numbers<[1], [0], [0], [1], [0, 0, 1, 1], [], []>} : vector<16x32xf32>, vector<32x128xf32>, vector<16x128xf32> -> vector<16x128xf32>
    %10 = vector.shape_cast %9 : vector<16x128xf32> to vector<2x8x128xf32>
    %c0_11 = arith.constant 0 : index
    %c0_12 = arith.constant 0 : index
    %11 = vector.load %arg6[%c0_11, %c0_12] : memref<1x128xf32, #tpu.memory_space<vmem>>, vector<1x128xf32>
    %12 = vector.shape_cast %11 : vector<1x128xf32> to vector<1x1x128xf32>
    %13 = vector.broadcast %12 : vector<1x1x128xf32> to vector<2x8x128xf32>
    %14 = arith.addf %10, %13 : vector<2x8x128xf32>
    %15 = vector.shape_cast %6 : vector<2x128xf32> to vector<2x1x128xf32>
    %16 = vector.broadcast %15 : vector<2x1x128xf32> to vector<2x8x128xf32>
    %17 = arith.addf %16, %14 : vector<2x8x128xf32>
    %18 = math.tanh %17 : vector<2x8x128xf32>
    %c0_13 = arith.constant 0 : index
    %c0_14 = arith.constant 0 : index
    %19 = vector.load %arg7[%c0_13, %c0_14] : memref<1x128xf32, #tpu.memory_space<vmem>>, vector<1x128xf32>
    %20 = vector.shape_cast %19 : vector<1x128xf32> to vector<1x1x128xf32>
    %21 = vector.broadcast %20 : vector<1x1x128xf32> to vector<2x8x128xf32>
    %22 = arith.mulf %18, %21 : vector<2x8x128xf32>
    %cst_15 = arith.constant dense<0.000000e+00> : vector<2x8xf32>
    %23 = vector.multi_reduction <add>, %22, %cst_15 [2] : vector<2x8x128xf32> to vector<2x8xf32>
    %c0_16 = arith.constant 0 : index
    %c0_17 = arith.constant 0 : index
    %24 = memref.load %arg8[%c0_16, %c0_17] : memref<1x1xf32, #tpu.memory_space<smem>>
    %25 = vector.broadcast %24 : f32 to vector<2x8xf32>
    %26 = arith.addf %23, %25 : vector<2x8xf32>
    %cst_18 = arith.constant dense<0xFF800000> : vector<2xf32>
    %27 = vector.multi_reduction <maximumf>, %26, %cst_18 [1] : vector<2x8xf32> to vector<2xf32>
    %28 = vector.shape_cast %27 : vector<2xf32> to vector<2x1xf32>
    %29 = vector.broadcast %28 : vector<2x1xf32> to vector<2x8xf32>
    %30 = arith.subf %26, %29 : vector<2x8xf32>
    %31 = math.exp %30 : vector<2x8xf32>
    %cst_19 = arith.constant dense<0.000000e+00> : vector<2xf32>
    %32 = vector.multi_reduction <add>, %31, %cst_19 [1] : vector<2x8xf32> to vector<2xf32>
    %33 = vector.shape_cast %32 : vector<2xf32> to vector<2x1xf32>
    %34 = tpu.reciprocal %33 {approx = true} : vector<2x1xf32> -> vector<2x1xf32>
    %35 = arith.mulf %33, %34 : vector<2x1xf32>
    %cst_20 = arith.constant 2.000000e+00 : f32
    %36 = vector.broadcast %cst_20 : f32 to vector<2x1xf32>
    %37 = arith.subf %36, %35 : vector<2x1xf32>
    %38 = arith.mulf %34, %37 : vector<2x1xf32>
    %39 = vector.broadcast %38 : vector<2x1xf32> to vector<2x8xf32>
    %40 = arith.mulf %31, %39 : vector<2x8xf32>
    %41 = vector.shape_cast %40 : vector<2x8xf32> to vector<2x1x8xf32>
    "tpu.trace_start"() <{level = 10 : i32, message = "bqs,bsd->bqd"}> : () -> ()
    %cst_21 = arith.constant dense<0.000000e+00> : vector<2x1x32xf32>
    %42 = tpu.matmul %41, %1, %cst_21 {dimension_numbers = #tpu.dot_dimension_numbers<[2], [1], [1], [2], [0, 0, 0, 1, 1, 2], [0], [0]>} : vector<2x1x8xf32>, vector<2x8x32xf32>, vector<2x1x32xf32> -> vector<2x1x32xf32>
    "tpu.trace_stop"() : () -> ()
    %43 = vector.shape_cast %42 : vector<2x1x32xf32> to vector<2x32xf32>
    %c0_22 = arith.constant 0 : index
    %c0_23 = arith.constant 0 : index
    %44 = vector.load %arg9[%c0_22, %c0_23] : memref<2x32xf32, #tpu.memory_space<vmem>>, vector<2x32xf32>
    tpu.vector_store %arg9[%c0_22, %c0_23], %43 {strides = array<i32>} : memref<2x32xf32, #tpu.memory_space<vmem>>, vector<2x32xf32>,
    return
  }
  func.func @transform_0(%arg0: i32) -> (i32, i32) {
    %c0_i32 = arith.constant 0 : i32
    %c0_i32_0 = arith.constant 0 : i32
    return %arg0, %c0_i32 : i32, i32
  }
  func.func @transform_1(%arg0: i32) -> (i32, i32, i32) {
    %c0_i32 = arith.constant 0 : i32
    %c0_i32_0 = arith.constant 0 : i32
    %c0_i32_1 = arith.constant 0 : i32
    return %arg0, %c0_i32, %c0_i32_0 : i32, i32, i32
  }
  func.func @transform_2(%arg0: i32) -> (i32, i32) {
    %c0_i32 = arith.constant 0 : i32
    %c0_i32_0 = arith.constant 0 : i32
    %c0_i32_1 = arith.constant 0 : i32
    return %c0_i32, %c0_i32_0 : i32, i32
  }
  func.func @transform_3(%arg0: i32) -> (i32, i32) {
    %c0_i32 = arith.constant 0 : i32
    %c0_i32_0 = arith.constant 0 : i32
    %c0_i32_1 = arith.constant 0 : i32
    return %c0_i32, %c0_i32_0 : i32, i32
  }
  func.func @transform_4(%arg0: i32) -> (i32, i32) {
    %c0_i32 = arith.constant 0 : i32
    %c0_i32_0 = arith.constant 0 : i32
    %c0_i32_1 = arith.constant 0 : i32
    return %c0_i32, %c0_i32_0 : i32, i32
  }
  func.func @transform_5(%arg0: i32) -> (i32, i32) {
    %c0_i32 = arith.constant 0 : i32
    %c0_i32_0 = arith.constant 0 : i32
    %c0_i32_1 = arith.constant 0 : i32
    return %c0_i32, %c0_i32_0 : i32, i32
  }
  func.func @transform_6(%arg0: i32) -> (i32, i32) {
    %c0_i32 = arith.constant 0 : i32
    %c0_i32_0 = arith.constant 0 : i32
    %c0_i32_1 = arith.constant 0 : i32
    return %c0_i32, %c0_i32_0 : i32, i32
  }
  func.func @transform_7(%arg0: i32) -> (i32, i32) {
    %c0_i32 = arith.constant 0 : i32
    %c0_i32_0 = arith.constant 0 : i32
    %c0_i32_1 = arith.constant 0 : i32
    return %c0_i32, %c0_i32_0 : i32, i32
  }
  func.func @transform_8(%arg0: i32) -> (i32, i32) {
    %c0_i32 = arith.constant 0 : i32
    %c0_i32_0 = arith.constant 0 : i32
    return %arg0, %c0_i32 : i32, i32
  }
}

</mosaic_0001>

<bundles_post_ra>
// kernel: tpu_custom_call.1
= control target key start
LH: loop header
LB: loop body
LE: loop exit
PB: predicated region body
PF: predicated region fallthrough
CT: control target
= control target key end

     0   :  { %14 = vsyncpa [#allocation4], 0  ;;  %s831_s0 = inlined_call_operand.vmem [shape: f32[2,32], index: 0, kind: input, shape index: {}]   ;;  %s832_s1 = inlined_call_operand.hbm [shape: f32[2,8,32], index: 1, kind: input, shape index: {}]   ;;  %s833_s2 = inlined_call_operand.hbm [shape: f32[32,128], index: 2, kind: input, shape index: {}]   ;;  %s834_s3 = inlined_call_operand.vmem [shape: f32[1,128], index: 3, kind: input, shape index: {}]   ;;  %s835_s4 = inlined_call_operand.hbm [shape: f32[32,128], index: 4, kind: input, shape index: {}]   ;;  %s836_s5 = inlined_call_operand.vmem [shape: f32[1,128], index: 5, kind: input, shape index: {}]   ;;  %s837_s6 = inlined_call_operand.vmem [shape: f32[1,128], index: 6, kind: input, shape index: {}]   ;;  %s838_s7 = inlined_call_operand.<no memory space> [shape: f32[1,1], index: 7, kind: input, shape index: {}]   ;;  %s839_s8 = inlined_call_operand.hbm [shape: f32[2,32], index: 8, kind: output, shape index: {}]  }
   0x1   :  { %15 = vsyncpa [#allocation7], 0 }
   0x2   :  { %16 = vsyncpa [#allocation5], 0  ;;  %s729_s27 = smov [#allocation6]   ;;  %s730_s29 = smov [#allocation3]  }
   0x3   :  { %s36_s28 = sshll.u32 %s729_s27, 4  ;;  %s24_s30 = sshll.u32 %s730_s29, 4  ;;  %s37_s28 = int_to_ptr.vmem [resolvable:$true] %s36_s28  ;;  %s25_s30 = int_to_ptr.vmem [resolvable:$true] %s24_s30 }
   0x4   :  { %s651_s9 = scalar_lea.vmem %s37_s28, 512  ;;  %p656_p1 = scmp.lt.s32.totalorder %s37_s28, %s37_s28 }
   0x5   :  { %p652_p0 = scmp.ne.s32.totalorder %s37_s28, %s651_s9  ;;  %p657_p2 = scmp.lt.s32.totalorder %s651_s9, %s651_s9 }
   0x7   :  { %p658_p3 = por %p657_p2, %p656_p1 }
   0x9   :  { %p659_p4 = pnand %p658_p3, %p652_p0 }
   0xb   :  { %662 = shalt.err (!%p659_p4)
}
   0xc   :  { %s731_s10 = smov 128   ;;  %s732_s11 = smov 8  }
   0xd   :  { %42 = dma.hbm_to_vmem [thread:$0]  %s833_s2, 512, %s37_s28, [#allocation7], %s731_s10, %s731_s10, %s732_s11  }
   0xe   :  { %s671_s14 = scalar_lea.vmem %s25_s30, 256  ;;  %p676_p6 = scmp.lt.s32.totalorder %s25_s30, %s25_s30 }
   0xf   :  { %p672_p5 = scmp.ne.s32.totalorder %s25_s30, %s671_s14  ;;  %p677_p7 = scmp.lt.s32.totalorder %s671_s14, %s671_s14 }
  0x11   :  { %p678_p8 = por %p677_p7, %p676_p6 }
  0x13   :  { %p679_p9 = pnand %p678_p8, %p672_p5 }
  0x15   :  { %682 = shalt.err (!%p679_p9)
}
  0x16   :  { %30 = dma.hbm_to_vmem [thread:$0]  %s832_s1, 256, %s25_s30, [#allocation4], %s731_s10, %s731_s10, %s732_s11  }
  0x17   :  { %s733_s17 = smov [#allocation8]  }
  0x18   :  { %s50_s18 = sshll.u32 %s733_s17, 4  ;;  %s51_s18 = int_to_ptr.vmem [resolvable:$true] %s50_s18 }
  0x19   :  { %s691_s19 = scalar_lea.vmem %s51_s18, 512  ;;  %p696_p11 = scmp.lt.s32.totalorder %s51_s18, %s51_s18 }
  0x1a   :  { %p692_p10 = scmp.ne.s32.totalorder %s51_s18, %s691_s19  ;;  %p697_p12 = scmp.lt.s32.totalorder %s691_s19, %s691_s19 }
  0x1c   :  { %p698_p13 = por %p697_p12, %p696_p11 }
  0x1e   :  { %p699_p0 = pnand %p698_p13, %p692_p10 }
  0x20   :  { %702 = shalt.err (!%p699_p0)
}
  0x21   :  { %56 = dma.hbm_to_vmem [thread:$0]  %s835_s4, 512, %s51_s18, [#allocation7], %s731_s10, %s731_s10, %s732_s11  }
  0x22   :  { %723 = dma.done.wait [#allocation4], 256  }
  0x23   :  { %724 = vsyncadd [#allocation4], 4294967040 }
  0x24   :  { %725 = dma.done.wait [#allocation7], 1024  }
  0x25   :  { %726 = vsyncadd [#allocation7], 4294966272  ;;  %v734_v0 = vmov 0.0   ;;  %vm735_vm0 = vmmov 0   ;;  %v78_v1 = vld [vmem:[#allocation6 + $0x18] sm:$0xff]  ;;  %v77_v3 = vld [vmem:[#allocation6 + $0x10] sm:$0xff]  ;;  %v258_v14 = vlaneseq  ;;  %v305_v42 = vstv %s838_s7 }
  0x26   :  { %589 = vmatprep.subr.mxu0 %v734_v0  ;;  %597 = vmatprep.mubr.msk.f32.mxu0 %vm735_vm0, %v734_v0  ;;  %v163_v2 = vld [vmem:[#allocation8 + $0x18] sm:$0xff]  ;;  %v162_v4 = vld [vmem:[#allocation8 + $0x10] sm:$0xff]  ;;  %v76_v5 = vld [vmem:[#allocation6 + $0x8] sm:$0xff]  ;;  %vm86_vm1 = vcmask 261120   ;;  %v736_v12 = vmov 1966171168  }
  0x27   :  { %590 = vmatpush3.msra.mxu0 %v78_v1  ;;  %600 = vmatprep.subr.mxu1 %v163_v2  ;;  %v161_v6 = vld [vmem:[#allocation8 + $0x8] sm:$0xff]  ;;  %v75_v7 = vld [vmem:[#allocation6] sm:$0xff]  ;;  %v72_v9 = vld [vmem:[%s831_s0] sm:$0x3]  ;;  %v256_v13 = vunpack.c.l.s4 %v736_v12  ;;  %v799_v16 = vshrl.u32 %v258_v14, 7  ;;  %v311_v41 = vand.u32 127, %v258_v14 }
  0x28   :  { %591 = vmatprep.subr.mxu0 %v734_v0  ;;  %601 = vmatpush3.msra.mxu1 %v163_v2  ;;  %v160_v8 = vld [vmem:[#allocation8] sm:$0xff]  ;;  %v73_v10 = vld [vmem:[#allocation3] sm:$0xff]  ;;  %v74_v11 = vld [vmem:[#allocation3 + $0x8] sm:$0xff]  ;;  %vm320_vm2 = vcmask 1041409   ;;  %vm323_vm3 = vcmask 58368   ;;  %v737_v52 = vmov 0  }
  0x29   :  { %592 = vmatpush3.msra.mxu0 %v77_v3  ;;  %602 = vmatprep.subr.mxu1 %v162_v4  ;;  %v257_v15 = vunpack.c.0.s8 %v256_v13  ;;  %v566_v17 = vld [vmem:[%s834_s3] ss:$0 sm:$0xff]  ;;  %v806_v24 = vsub.s32 0, %v799_v16  ;;  %v314_v44 = vsub.s32 %v311_v41, %v799_v16  ;;  %v334_v53 = vsub.s32 1, %v799_v16 }
  0x2a   :  { %593 = vmatprep.subr.mxu0 %v734_v0  ;;  %603 = vmatpush3.msra.mxu1 %v162_v4  ;;  %v570_v25 = vld [vmem:[%s836_s5] ss:$0 sm:$0xff]  ;;  %vm390_vm4 = vcmask 64512   ;;  %vm548_vm5 = vcmask 254976  }
  0x2b   :  { %594 = vmatpush3.msra.mxu0 %v76_v5  ;;  %604 = vmatprep.subr.mxu1 %v161_v6  ;;  %v260_v18 = vsub.s32 %v257_v15, %v799_v16  ;;  %v571_v36 = vld [vmem:[%s837_s6] ss:$0 sm:$0xff]  ;;  %s738_s6 = smov [#allocation9]  }
  0x2c   :  { %595 = vmatprep.subr.mxu0 %v734_v0  ;;  %605 = vmatpush3.msra.mxu1 %v161_v6  ;;  %s556_s7 = sshll.u32 %s738_s6, 4  ;;  %s557_s7 = int_to_ptr.vmem [resolvable:$true] %s556_s7 }
  0x2d   :  { %596 = vmatpush3.msra.mxu0 %v75_v7  ;;  %606 = vmatprep.subr.mxu1 %v160_v8  ;;  %s703_s26 = scalar_lea.vmem %s557_s7, 32  ;;  %p708_p2 = scmp.lt.s32.totalorder %s557_s7, %s557_s7 }
  0x2e   :  { %598 = vmatmul.mubr.msk.f32.vlgmr.msra.gmra.mxu0 %vm86_vm1, %v72_v9  ;;  %607 = vmatpush3.msra.mxu1 %v160_v8  ;;  %p704_p1 = scmp.ne.s32.totalorder %s557_s7, %s703_s26  ;;  %p709_p3 = scmp.lt.s32.totalorder %s703_s26, %s703_s26 }
  0x2f   :  { %608 = vmatprep.mubr.msk.f32.mxu1 %vm86_vm1, %v73_v10  ;;  %616 = vmatprep.subr.mxu1 %v734_v0 }
  0x30   :  { %609 = vmatmul.mubr.msk.f32.vlgmr.msra.gmra.mxu1 %vm86_vm1, %v74_v11  ;;  %611 = vmatprep.subr.mxu0 %v734_v0  ;;  %p710_p4 = por %p709_p3, %p708_p2 }
  0x31   :  { %617 = vmatpush3.msra.mxu1 %v74_v11  ;;  %618 = vmatprep.mubr.msk.f32.mxu1 %vm735_vm0, %v734_v0 }
  0x32   :  { %612 = vmatpush3.msra.mxu0 %v73_v10  ;;  %613 = vmatprep.mubr.msk.f32.mxu0 %vm735_vm0, %v734_v0  ;;  %p711_p5 = pnand %p710_p4, %p704_p1 }
  0x33   :  { %632 = vset.pattern.permute.xlu0 %v737_v52  ;;  %631 = vset.pattern.permute.xlu1 %v737_v52 }
  0xee   :  { %v156_v19 = vpop.f32.mrf.mxu0 }
  0xef   :  { %v157_v20 = vadd.f32 %v566_v17, %v156_v19 }
  0xf0   :  { %v599_v21 = vpop.f32.mrf.mxu0  ;;  %v610_v22 = vpop.f32.mrf.mxu1 }
  0xf1   :  { %v261_v23 = vrot.slane %v157_v20, %v260_v18  ;;  %v253_v32 = vadd.f32 %v610_v22, %v570_v25 }
  0xf2   :  { %v236_v26 = vpop.f32.mrf.mxu1 }
  0xf3   :  { %v262_v27 = vcombine.high %v261_v23, %v261_v23  ;;  %v269_v28 = vrot.slane %v261_v23, %v260_v18  ;;  %v252_v30 = vadd.f32 %v570_v25, %v236_v26 }
  0xf5   :  { %v276_v29 = vrot.slane %v262_v27, %v260_v18  ;;  %v280_v31 = vrot.slane %v269_v28, %v806_v24 }
  0xf7   :  { %v284_v33 = vrot.slane %v276_v29, %v806_v24  ;;  %v287_v34 = vadd.f32 %v280_v31, %v252_v30 }
  0xf9   :  { %v288_v35 = vadd.f32 %v284_v33, %v253_v32  ;;  %633 = vtanh.f32 %v287_v34 }
  0xfb   :  { %635 = vtanh.f32 %v288_v35 }
 0x106   :  { %v634_v37 = vpop.eup %633 }
 0x107   :  { %v298_v38 = vmul.f32 %v634_v37, %v571_v36 }
 0x108   :  { %v636_v39 = vpop.eup %635 }
 0x109   :  { %300 = vadd.xlane.f32.xlu0 %v298_v38  ;;  %v299_v40 = vmul.f32 %v636_v39, %v571_v36 }
 0x10d   :  { %302 = vadd.xlane.f32.xlu0 %v299_v40 }
 0x192   :  { %v301_v43 = vpop.xlane.xlu0 %300 }
 0x193   :  { %v306_v45 = vadd.f32 %v305_v42, %v301_v43 }
 0x195   :  { %v315_v48 = vrot.slane %v306_v45, %v314_v44 }
 0x196   :  { %v303_v46 = vpop.xlane.xlu0 %302 }
 0x197   :  { %v307_v47 = vadd.f32 %v305_v42, %v303_v46 }
 0x199   :  { %v319_v49 = vrot.slane %v307_v47, %v314_v44 }
 0x19b   :  { %v321_v50 = vsel %vm320_vm2, %v319_v49, %v315_v48 }
 0x19c   :  { %v324_v51 = vsel %vm323_vm3, %v321_v50, -inf }
 0x19d   :  { %325 = vmax.xlane.f32.xlu1 %v324_v51 }
 0x226   :  { %v326_v54 = vpop.xlane.xlu1 %325 }
 0x227   :  { %v331_v55 = vrot.slane %v326_v54, %v806_v24  ;;  %v335_v56 = vrot.slane %v326_v54, %v334_v53 }
 0x229   :  { %v338_v57 = vsub.f32 %v306_v45, %v331_v55  ;;  %v339_v58 = vsub.f32 %v307_v47, %v335_v56 }
 0x22b   :  { %v340_v59 = vmul.f32 1.442695, %v338_v57  ;;  %v342_v60 = vmul.f32 1.442695, %v339_v58 }
 0x22d   :  { %637 = vpow2.f32 %v340_v59 }
 0x22e   :  { %639 = vpow2.f32 %v342_v60 }
 0x23a   :  { %v638_v61 = vpop.eup %637 }
 0x23b   :  { %v640_v62 = vpop.eup %639  ;;  %347 = vperm.xlu1 %631, %v638_v61  }
 0x23c   :  { %350 = vperm.xlu0 %632, %v640_v62  }
 0x2b6   :  { %v348_v63 = vpop.permute.xlu1 %347 }
 0x2b7   :  { %v351_v0 = vpop.permute.xlu0 %350  ;;  %v355_v1 = vrot.slane %v348_v63, %v314_v44 }
 0x2b8   :  { %v359_v2 = vrot.slane %v351_v0, %v314_v44 }
 0x2ba   :  { %v360_v3 = vsel %vm320_vm2, %v359_v2, %v355_v1 }
 0x2bb   :  { %v362_v4 = vsel %vm323_vm3, %v360_v3, 0.0 }
 0x2bc   :  { %363 = vadd.xlane.f32.xlu1 %v362_v4 }
 0x345   :  { %v364_v5 = vpop.xlane.xlu1 %363 }
 0x346   :  { %641 = vrcp.f32 %v364_v5 }
 0x353   :  { %v642_v6 = vpop.eup %641 }
 0x354   :  { %v366_v7 = vmul.f32 %v642_v6, %v364_v5 }
 0x356   :  { %v367_v8 = vsub.f32 2.0, %v366_v7 }
 0x358   :  { %v368_v9 = vmul.f32 %v642_v6, %v367_v8 }
 0x35a   :  { %v377_v10 = vrot.slane %v368_v9, %v334_v53  ;;  %v373_v11 = vrot.slane %v368_v9, %v806_v24 }
 0x35c   :  { %v381_v12 = vmul.f32 %v640_v62, %v377_v10  ;;  %v380_v13 = vmul.f32 %v638_v61, %v373_v11 }
 0x35e   :  { %465 = vperm.xlu0 %632, %v381_v12  }
 0x362   :  { %384 = vperm.xlu0 %632, %v380_v13  }
 0x3d9   :  { %v466_v14 = vpop.permute.xlu0 %465 }
 0x3da   :  { %v470_v15 = vrot.slane %v466_v14, %v314_v44 }
 0x3dc   :  { %619 = vmatmul.mubr.msk.f32.vlgmr.msra.gmra.mxu1 %vm390_vm4, %v470_v15 }
 0x3dd   :  { %v385_v16 = vpop.permute.xlu0 %384 }
 0x3de   :  { %v389_v17 = vrot.slane %v385_v16, %v314_v44 }
 0x3e0   :  { %614 = vmatmul.mubr.msk.f32.vlgmr.msra.gmra.mxu0 %vm390_vm4, %v389_v17 }
 0x49c   :  { %v539_v18 = vpop.f32.mrf.mxu1 }
 0x49d   :  { %v545_v20 = vrot.slane %v539_v18, 7 }
 0x49e   :  { %v620_v19 = vpop.f32.mrf.mxu1 }
 0x4a0   :  { %v459_v21 = vpop.f32.mrf.mxu0 }
 0x4a1   :  { %v546_v22 = vsel %vm320_vm2, %v545_v20, %v459_v21 }
 0x4a2   :  { %v615_v23 = vpop.f32.mrf.mxu0  ;;  %549 = vst.msk [vmem:[#allocation9] sm:$0x3] %vm548_vm5, %v546_v22 }
 0x4a3   :  { %714 = shalt.err (!%p711_p5)
}
 0x4a4   :  { %559 = dma.vmem_to_hbm [thread:$0]  %s557_s7, 32, %s839_s8, [#allocation5]  }
 0x4a5   :  { %727 = dma.done.wait [#allocation5], 32  }
 0x4a6   :  { %728 = vsyncadd [#allocation5], 4294967264 }
 0x4a7   :  { %563 = vsyncpa [#allocation4], 1 }
 0x4a8   :  { %564 = vsyncpa [#allocation7], 1 }
 0x4a9   :  { %565 = vsyncpa [#allocation5], 1 }

</bundles_post_ra>
